<compile_context>
chip_gen: v7x
topology: tpu7x:2x2x1
jax: 0.10.0
libtpu: 0.0.40
codegen_flags: <defaults>
</compile_context>

<pallas_src>
import functools

import jax
import jax.numpy as jnp
from jax.experimental import pallas as pl
from jax.experimental.pallas import tpu as pltpu

_LANE = 128
_SUBLANE = 8


# ----------------------------------------------------------------------------
# Kernels
# ----------------------------------------------------------------------------
def _mm_single_kernel(beta, x_ref, min_ref, max_ref,
                      y_ref, new_min_ref, new_max_ref):
    """Single pass: one (N, tile_d) column strip per grid step."""
    xf = x_ref[...].astype(jnp.float32)                 # (N, tile_d)
    col_min = jnp.min(xf, axis=0, keepdims=True)        # (1, tile_d)
    col_max = jnp.max(xf, axis=0, keepdims=True)

    old_min = min_ref[...].astype(jnp.float32)          # (1, tile_d)
    old_max = max_ref[...].astype(jnp.float32)

    new_min = old_min * beta + col_min * (1.0 - beta)
    new_max = old_max * beta + col_max * (1.0 - beta)

    new_min_ref[...] = new_min
    new_max_ref[...] = new_max

    # Row-wise reciprocal once (1, tile_d) + VPU multiplies over (N, tile_d),
    # instead of N*tile_d divides through the single EUP slot.
    inv = pl.reciprocal(new_max - new_min, approx=False)
    y_ref[...] = ((xf - new_min) * inv).astype(y_ref.dtype)


def _mm_pass1_kernel(beta, x_ref, min_ref, max_ref,
                     new_min_ref, new_max_ref, run_min, run_max):
    """Large-N pass 1: reduce col min/max over N tiles (reduction axis last)."""
    i = pl.program_id(1)

    @pl.when(i == 0)
    def _():
        run_min[...] = jnp.full_like(run_min, jnp.inf)
        run_max[...] = jnp.full_like(run_max, -jnp.inf)

    xf = x_ref[...].astype(jnp.float32)                  # (tile_n, tile_d)
    run_min[...] = jnp.minimum(run_min[...], jnp.min(xf, axis=0, keepdims=True))
    run_max[...] = jnp.maximum(run_max[...], jnp.max(xf, axis=0, keepdims=True))

    @pl.when(i == pl.num_programs(1) - 1)
    def _():
        old_min = min_ref[...].astype(jnp.float32)
        old_max = max_ref[...].astype(jnp.float32)
        new_min_ref[...] = old_min * beta + run_min[...] * (1.0 - beta)
        new_max_ref[...] = old_max * beta + run_max[...] * (1.0 - beta)


def _mm_pass2_kernel(x_ref, min_ref, max_ref, y_ref):
    """Large-N pass 2: normalize each (tile_n, tile_d) tile."""
    xf = x_ref[...].astype(jnp.float32)
    new_min = min_ref[...]
    new_max = max_ref[...]
    inv = pl.reciprocal(new_max - new_min, approx=False)
    y_ref[...] = ((xf - new_min) * inv).astype(y_ref.dtype)


# ----------------------------------------------------------------------------
# Hardware query + tile selection
# ----------------------------------------------------------------------------
def _tpu_vmem_and_cores():
    """Per-generation physical VMEM bytes and TensorCores per chip."""
    vmem_physical = 64 * 1024 * 1024   # conservative default (v7x per-TC)
    num_cores = 1
    try:
        info = pltpu.get_tpu_info()
        vmem_physical = int(getattr(info, "vmem_capacity_bytes", vmem_physical))
    except Exception:
        pass
    try:
        kind = jax.devices()[0].device_kind.lower()
        if "v7" in kind:
            num_cores = 2
    except Exception:
        pass
    return vmem_physical, num_cores


def _d_candidates(D):
    cands = {d for d in range(_LANE, D + 1, _LANE) if D % d == 0}
    cands.add(D)  # full-extent last dim is always a legal block dim
    return cands


def _n_candidates(N):
    cands = {n for n in range(_SUBLANE, N + 1, _SUBLANE) if N % n == 0}
    cands.add(N)
    return cands


def _choose_tiles(N, D, itemsize, budget_bytes, num_cores):
    """Returns ("single", tile_d, None) or ("two_pass", tile_d, tile_n)."""
    d_cands = _d_candidates(D)

    def bytes_single(td):
        # double-buffered x (in) + y (out) strips + (1, td) min/max ins/outs.
        return 4 * N * td * itemsize + 16 * td * 4

    fitting = [td for td in d_cands if bytes_single(td) <= budget_bytes]
    if fitting:
        if num_cores >= 2:
            # Keep >= 2 grid steps only when both strips stay >= 512 lanes wide,
            # so the "parallel" D axis can shard across both TensorCores.
            multi = [td for td in fitting if D // td >= 2 and td >= 512]
            if multi:
                return ("single", max(multi), None)
        return ("single", max(fitting), None)

    # Large-N fallback: two-pass, tiling N as well. Pass 2 dominates VMEM.
    def bytes_two_pass(tn, td):
        return 4 * tn * td * itemsize + 48 * td * 4

    n_cands = sorted(_n_candidates(N), reverse=True)
    for td in sorted(d_cands, reverse=True):          # prefer wide lane strips
        for tn in n_cands:                            # then as many rows as fit
            if bytes_two_pass(tn, td) <= budget_bytes:
                return ("two_pass", td, tn)

    raise ValueError(
        f"MovingMinMax: no tile of shape ({_SUBLANE}, {_LANE}) fits the VMEM "
        f"budget ({budget_bytes} bytes) for N={N}, D={D}, itemsize={itemsize}.")


# ----------------------------------------------------------------------------
# Wrapper
# ----------------------------------------------------------------------------
def moving_minmax(x, min_val, max_val, beta=0.1, tile_d=None, tile_n=None,
                  vmem_limit_bytes=None):
    """x: (N, D); min_val/max_val: (D,) f32. Returns (y, new_min, new_max)."""
    N, D = x.shape
    itemsize = jnp.dtype(x.dtype).itemsize

    vmem_physical, num_cores = _tpu_vmem_and_cores()
    if vmem_limit_bytes is None:
        # ~96 MiB on 128 MiB chips (v5e/v6e), ~48 MiB on 64 MiB chips (v7x).
        vmem_limit_bytes = (vmem_physical * 3) // 4
    budget_bytes = vmem_limit_bytes - (4 << 20)  # headroom for bookkeeping

    if tile_d is None and tile_n is None:
        mode, tile_d, tile_n = _choose_tiles(N, D, itemsize, budget_bytes,
                                             num_cores)
    else:
        if tile_d is None:
            tile_d = D
        mode = "two_pass" if tile_n is not None else "single"

    assert D % tile_d == 0, "tile_d must divide D"
    if tile_n is not None:
        assert N % tile_n == 0, "tile_n must divide N"

    min2 = min_val.reshape(1, D).astype(jnp.float32)
    max2 = max_val.reshape(1, D).astype(jnp.float32)

    cost = pl.CostEstimate(
        flops=int(4 * N * D),
        transcendentals=int(D),
        bytes_accessed=int((2 * N * D) * itemsize + 5 * D * 4),
    )
    cparams = lambda sem: pltpu.CompilerParams(
        dimension_semantics=sem, vmem_limit_bytes=int(vmem_limit_bytes))

    if mode == "single":
        kernel = functools.partial(_mm_single_kernel, float(beta))
        y, new_min, new_max = pl.pallas_call(
            kernel,
            out_shape=(
                jax.ShapeDtypeStruct((N, D), x.dtype),
                jax.ShapeDtypeStruct((1, D), jnp.float32),
                jax.ShapeDtypeStruct((1, D), jnp.float32),
            ),
            grid_spec=pltpu.PrefetchScalarGridSpec(
                num_scalar_prefetch=0,
                grid=(D // tile_d,),
                in_specs=[
                    pl.BlockSpec((N, tile_d), lambda j: (0, j)),
                    pl.BlockSpec((1, tile_d), lambda j: (0, j)),
                    pl.BlockSpec((1, tile_d), lambda j: (0, j)),
                ],
                out_specs=[
                    pl.BlockSpec((N, tile_d), lambda j: (0, j)),
                    pl.BlockSpec((1, tile_d), lambda j: (0, j)),
                    pl.BlockSpec((1, tile_d), lambda j: (0, j)),
                ],
            ),
            compiler_params=cparams(("parallel",)),
            cost_estimate=cost,
        )(x, min2, max2)
        return y, new_min.reshape(D), new_max.reshape(D)

    # ---- two-pass path (N too large for a full column strip in VMEM) ----
    grid2 = (D // tile_d, N // tile_n)

    new_min, new_max = pl.pallas_call(
        functools.partial(_mm_pass1_kernel, float(beta)),
        out_shape=(
            jax.ShapeDtypeStruct((1, D), jnp.float32),
            jax.ShapeDtypeStruct((1, D), jnp.float32),
        ),
        grid_spec=pltpu.PrefetchScalarGridSpec(
            num_scalar_prefetch=0,
            grid=grid2,
            in_specs=[
                pl.BlockSpec((tile_n, tile_d), lambda j, i: (i, j)),
                pl.BlockSpec((1, tile_d), lambda j, i: (0, j)),
                pl.BlockSpec((1, tile_d), lambda j, i: (0, j)),
            ],
            out_specs=[
                pl.BlockSpec((1, tile_d), lambda j, i: (0, j)),
                pl.BlockSpec((1, tile_d), lambda j, i: (0, j)),
            ],
            scratch_shapes=[
                pltpu.VMEM((1, tile_d), jnp.float32),
                pltpu.VMEM((1, tile_d), jnp.float32),
            ],
        ),
        compiler_params=cparams(("parallel", "arbitrary")),
        cost_estimate=pl.CostEstimate(
            flops=int(2 * N * D), transcendentals=0,
            bytes_accessed=int(N * D * itemsize + 4 * D * 4)),
    )(x, min2, max2)

    y = pl.pallas_call(
        _mm_pass2_kernel,
        out_shape=jax.ShapeDtypeStruct((N, D), x.dtype),
        grid_spec=pltpu.PrefetchScalarGridSpec(
            num_scalar_prefetch=0,
            grid=grid2,
            in_specs=[
                pl.BlockSpec((tile_n, tile_d), lambda j, i: (i, j)),
                pl.BlockSpec((1, tile_d), lambda j, i: (0, j)),
                pl.BlockSpec((1, tile_d), lambda j, i: (0, j)),
            ],
            out_specs=pl.BlockSpec((tile_n, tile_d), lambda j, i: (i, j)),
        ),
        compiler_params=cparams(("parallel", "parallel")),
        cost_estimate=pl.CostEstimate(
            flops=int(3 * N * D), transcendentals=int(D),
            bytes_accessed=int(2 * N * D * itemsize + 2 * D * 4)),
    )(x, new_min, new_max)

    return y, new_min.reshape(D), new_max.reshape(D)


# ----------------------------------------------------------------------------
# Self-test
# ----------------------------------------------------------------------------
if __name__ == "__main__":
    # Small deterministic example: batch N=16, feature dim D=256.
    N, D = 16, 256
    beta = 0.1

    key = jax.random.PRNGKey(0)
    x = jax.random.normal(key, (N, D), dtype=jnp.float32)

    # Deterministic parameter init (nn.Parameter(torch.zeros/ones(dim))).
    min_val = jnp.zeros((D,), dtype=jnp.float32)
    max_val = jnp.ones((D,), dtype=jnp.float32)

    # Pure-JAX reference.
    ref_min = min_val * beta + x.min(axis=0) * (1.0 - beta)
    ref_max = max_val * beta + x.max(axis=0) * (1.0 - beta)
    ref_y = (x - ref_min) / (ref_max - ref_min)

    # 1) Auto-tiled single-pass path.
    y, new_min, new_max = moving_minmax(x, min_val, max_val, beta=beta)
    jax.block_until_ready((y, new_min, new_max))
    assert jnp.allclose(new_min, ref_min, atol=1e-6, rtol=1e-6)
    assert jnp.allclose(new_max, ref_max, atol=1e-6, rtol=1e-6)
    assert jnp.allclose(y, ref_y, atol=1e-5, rtol=1e-5)

    # 2) Forced two-pass (large-N) path, exercised at small shape.
    y2, new_min2, new_max2 = moving_minmax(
        x, min_val, max_val, beta=beta, tile_d=128, tile_n=8)
    jax.block_until_ready((y2, new_min2, new_max2))
    assert jnp.allclose(new_min2, ref_min, atol=1e-6, rtol=1e-6)
    assert jnp.allclose(new_max2, ref_max, atol=1e-6, rtol=1e-6)
    assert jnp.allclose(y2, ref_y, atol=1e-5, rtol=1e-5)

    print("KERNEL_OK")
</pallas_src>

<mosaic_0001>
module attributes {stable_mosaic.version = 11 : i64} {
  func.func @_mm_single_kernel(%arg0: i32, %arg1: memref<16x256xf32, #tpu.memory_space<vmem>>, %arg2: memref<1x256xf32, #tpu.memory_space<vmem>>, %arg3: memref<1x256xf32, #tpu.memory_space<vmem>>, %arg4: memref<16x256xf32, #tpu.memory_space<vmem>>, %arg5: memref<1x256xf32, #tpu.memory_space<vmem>>, %arg6: memref<1x256xf32, #tpu.memory_space<vmem>>) attributes {dimension_semantics = [#tpu.dimension_semantics<parallel>], iteration_bounds = array<i64: 1>, scalar_prefetch = 0 : i64, scratch_operands = 0 : i64, tpu.core_type = #tpu.core_type<tc>, window_params = [{transform_indices = @transform_0, window_bounds = array<i64: 16, 256>}, {transform_indices = @transform_1, window_bounds = array<i64: 1, 256>}, {transform_indices = @transform_2, window_bounds = array<i64: 1, 256>}, {transform_indices = @transform_3, window_bounds = array<i64: 16, 256>}, {transform_indices = @transform_4, window_bounds = array<i64: 1, 256>}, {transform_indices = @transform_5, window_bounds = array<i64: 1, 256>}]} {
    %c0 = arith.constant 0 : index
    %c0_0 = arith.constant 0 : index
    %0 = vector.load %arg1[%c0, %c0_0] : memref<16x256xf32, #tpu.memory_space<vmem>>, vector<16x256xf32>
    %cst = arith.constant dense<0x7F800000> : vector<256xf32>
    %1 = vector.multi_reduction <minimumf>, %0, %cst [0] : vector<16x256xf32> to vector<256xf32>
    %2 = vector.shape_cast %1 : vector<256xf32> to vector<1x256xf32>
    %cst_1 = arith.constant dense<0xFF800000> : vector<256xf32>
    %3 = vector.multi_reduction <maximumf>, %0, %cst_1 [0] : vector<16x256xf32> to vector<256xf32>
    %4 = vector.shape_cast %3 : vector<256xf32> to vector<1x256xf32>
    %c0_2 = arith.constant 0 : index
    %c0_3 = arith.constant 0 : index
    %5 = vector.load %arg2[%c0_2, %c0_3] : memref<1x256xf32, #tpu.memory_space<vmem>>, vector<1x256xf32>
    %c0_4 = arith.constant 0 : index
    %c0_5 = arith.constant 0 : index
    %6 = vector.load %arg3[%c0_4, %c0_5] : memref<1x256xf32, #tpu.memory_space<vmem>>, vector<1x256xf32>
    %cst_6 = arith.constant 1.000000e-01 : f32
    %7 = vector.broadcast %cst_6 : f32 to vector<1x256xf32>
    %8 = arith.mulf %5, %7 : vector<1x256xf32>
    %cst_7 = arith.constant 0.899999976 : f32
    %9 = vector.broadcast %cst_7 : f32 to vector<1x256xf32>
    %10 = arith.mulf %2, %9 : vector<1x256xf32>
    %11 = arith.addf %8, %10 : vector<1x256xf32>
    %cst_8 = arith.constant 1.000000e-01 : f32
    %12 = vector.broadcast %cst_8 : f32 to vector<1x256xf32>
    %13 = arith.mulf %6, %12 : vector<1x256xf32>
    %cst_9 = arith.constant 0.899999976 : f32
    %14 = vector.broadcast %cst_9 : f32 to vector<1x256xf32>
    %15 = arith.mulf %4, %14 : vector<1x256xf32>
    %16 = arith.addf %13, %15 : vector<1x256xf32>
    %c0_10 = arith.constant 0 : index
    %c0_11 = arith.constant 0 : index
    %17 = vector.load %arg5[%c0_10, %c0_11] : memref<1x256xf32, #tpu.memory_space<vmem>>, vector<1x256xf32>
    tpu.vector_store %arg5[%c0_10, %c0_11], %11 {strides = array<i32>} : memref<1x256xf32, #tpu.memory_space<vmem>>, vector<1x256xf32>,
    %c0_12 = arith.constant 0 : index
    %c0_13 = arith.constant 0 : index
    %18 = vector.load %arg6[%c0_12, %c0_13] : memref<1x256xf32, #tpu.memory_space<vmem>>, vector<1x256xf32>
    tpu.vector_store %arg6[%c0_12, %c0_13], %16 {strides = array<i32>} : memref<1x256xf32, #tpu.memory_space<vmem>>, vector<1x256xf32>,
    %19 = arith.subf %16, %11 : vector<1x256xf32>
    %20 = tpu.reciprocal %19 : vector<1x256xf32> -> vector<1x256xf32>
    %21 = vector.broadcast %11 : vector<1x256xf32> to vector<16x256xf32>
    %22 = arith.subf %0, %21 : vector<16x256xf32>
    %23 = vector.broadcast %20 : vector<1x256xf32> to vector<16x256xf32>
    %24 = arith.mulf %22, %23 : vector<16x256xf32>
    %c0_14 = arith.constant 0 : index
    %c0_15 = arith.constant 0 : index
    %25 = vector.load %arg4[%c0_14, %c0_15] : memref<16x256xf32, #tpu.memory_space<vmem>>, vector<16x256xf32>
    tpu.vector_store %arg4[%c0_14, %c0_15], %24 {strides = array<i32>} : memref<16x256xf32, #tpu.memory_space<vmem>>, vector<16x256xf32>,
    return
  }
  func.func @transform_0(%arg0: i32) -> (i32, i32) {
    %c0_i32 = arith.constant 0 : i32
    %c0_i32_0 = arith.constant 0 : i32
    return %c0_i32, %arg0 : i32, i32
  }
  func.func @transform_1(%arg0: i32) -> (i32, i32) {
    %c0_i32 = arith.constant 0 : i32
    %c0_i32_0 = arith.constant 0 : i32
    return %c0_i32, %arg0 : i32, i32
  }
  func.func @transform_2(%arg0: i32) -> (i32, i32) {
    %c0_i32 = arith.constant 0 : i32
    %c0_i32_0 = arith.constant 0 : i32
    return %c0_i32, %arg0 : i32, i32
  }
  func.func @transform_3(%arg0: i32) -> (i32, i32) {
    %c0_i32 = arith.constant 0 : i32
    %c0_i32_0 = arith.constant 0 : i32
    return %c0_i32, %arg0 : i32, i32
  }
  func.func @transform_4(%arg0: i32) -> (i32, i32) {
    %c0_i32 = arith.constant 0 : i32
    %c0_i32_0 = arith.constant 0 : i32
    return %c0_i32, %arg0 : i32, i32
  }
  func.func @transform_5(%arg0: i32) -> (i32, i32) {
    %c0_i32 = arith.constant 0 : i32
    %c0_i32_0 = arith.constant 0 : i32
    return %c0_i32, %arg0 : i32, i32
  }
}

</mosaic_0001>

<bundles_post_ra>
// kernel: tpu_custom_call.1
= control target key start
LH: loop header
LB: loop body
LE: loop exit
PB: predicated region body
PF: predicated region fallthrough
CT: control target
= control target key end

     0   :  { %11 = vsyncpa [#allocation3], 0  ;;  %s429_s0 = inlined_call_operand.hbm [shape: f32[16,256], index: 0, kind: input, shape index: {}]   ;;  %s430_s1 = inlined_call_operand.vmem [shape: f32[1,256], index: 1, kind: input, shape index: {}]   ;;  %s431_s2 = inlined_call_operand.vmem [shape: f32[1,256], index: 2, kind: input, shape index: {}]   ;;  %s432_s3 = inlined_call_operand.hbm [shape: f32[16,256], index: 3, kind: output, shape index: {0}]   ;;  %s433_s4 = inlined_call_operand.hbm [shape: f32[1,256], index: 4, kind: output, shape index: {1}]   ;;  %s434_s5 = inlined_call_operand.hbm [shape: f32[1,256], index: 5, kind: output, shape index: {2}]  }
   0x1   :  { %12 = vsyncpa [#allocation4], 0 }
   0x2   :  { %13 = vsyncpa [#allocation7], 0  ;;  %s300_s18 = smov [#allocation2]   ;;  %s206_s22 = scalar_lea.hbm %s429_s0, 512 }
   0x3   :  { %s19_s19 = sshll.u32 %s300_s18, 4  ;;  %p207_p0 = scmp.ne.s32.totalorder %s429_s0, %s206_s22  ;;  %s20_s19 = int_to_ptr.vmem [resolvable:$true] %s19_s19 }
   0x4   :  { %p210_p1 = scmp.lt.u32.totalorder %s206_s22, %s429_s0 }
   0x6   :  { %p212_p2 = pnand %p210_p1, %p207_p0 }
   0x8   :  { %215 = shalt.err (!%p212_p2)
}
   0x9   :  { %s216_s27 = scalar_lea.vmem %s20_s19, 512  ;;  %p221_p4 = scmp.lt.s32.totalorder %s20_s19, %s20_s19 }
   0xa   :  { %p217_p3 = scmp.ne.s32.totalorder %s20_s19, %s216_s27  ;;  %p222_p5 = scmp.lt.s32.totalorder %s216_s27, %s216_s27 }
   0xc   :  { %p223_p6 = por %p222_p5, %p221_p4 }
   0xe   :  { %p224_p7 = pnand %p223_p6, %p217_p3 }
  0x10   :  { %227 = shalt.err (!%p224_p7)
}
  0x11   :  { %s301_s28 = smov 256   ;;  %s302_s29 = smov 16  }
  0x12   :  { %25 = dma.hbm_to_vmem [thread:$0]  %s429_s0, 512, %s20_s19, [#allocation3], %s301_s28, %s301_s28, %s302_s29  }
  0x13   :  { %294 = dma.done.wait [#allocation3], 512  }
  0x14   :  { %295 = vsyncadd [#allocation3], 4294966784  ;;  %v352_v0 = vld [vmem:[#allocation2] sm:$0xff]  ;;  %v354_v1 = vld [vmem:[#allocation2 + $0x8] sm:$0xff]  ;;  %v303_v19 = vmov 1966171168   ;;  %v76_v21 = vlaneseq }
  0x15   :  { %v356_v2 = vld [vmem:[#allocation2 + $0x10] sm:$0xff]  ;;  %v358_v3 = vld [vmem:[#allocation2 + $0x18] sm:$0xff]  ;;  %v74_v20 = vunpack.c.l.s4 %v303_v19  ;;  %v65_v42 = vld [vmem:[%s430_s1] sm:$0x3]  ;;  %s304_s10 = smov [#allocation6]   ;;  %s305_s12 = smov [#allocation8]  }
  0x16   :  { %v37_v4 = vmin.f32 %v352_v0, %v356_v2  ;;  %v51_v5 = vmax.f32 %v352_v0, %v356_v2  ;;  %v44_v6 = vmin.f32 %v354_v1, %v358_v3  ;;  %v58_v7 = vmax.f32 %v354_v1, %v358_v3  ;;  %v66_v43 = vld [vmem:[%s431_s2] sm:$0x3]  ;;  %s171_s11 = sshll.u32 %s304_s10, 4  ;;  %s181_s13 = sshll.u32 %s305_s12, 4  ;;  %s172_s11 = int_to_ptr.vmem [resolvable:$true] %s171_s11  ;;  %s377_s13 = int_to_ptr.vmem [resolvable:$true] %s181_s13 }
  0x17   :  { %v75_v30 = vunpack.c.0.s8 %v74_v20  ;;  %v368_v31 = vshrl.u32 %v76_v21, 7  ;;  %v67_v46 = vmul.f32 0.1, %v65_v42  ;;  %v89_v48 = vmul.f32 0.1, %v66_v43  ;;  %s228_s1 = scalar_lea.vmem %s172_s11, 32  ;;  %p233_p9 = scmp.lt.s32.totalorder %s172_s11, %s172_s11 }
  0x18   :  { %v38_v8 = vrot.slane %v37_v4, 4  ;;  %v52_v9 = vrot.slane %v51_v5, 4  ;;  %v45_v10 = vrot.slane %v44_v6, 4  ;;  %v59_v11 = vrot.slane %v58_v7, 4  ;;  %p229_p8 = scmp.ne.s32.totalorder %s172_s11, %s228_s1  ;;  %p234_p10 = scmp.lt.s32.totalorder %s228_s1, %s228_s1 }
  0x19   :  { %v78_v40 = vsub.s32 %v75_v30, %v368_v31  ;;  %vm113_vm0 = vcmp.lt.s32.totalorder %v76_v21, 256 }
  0x1a   :  { %v39_v12 = vmin.f32 %v37_v4, %v38_v8  ;;  %v53_v13 = vmax.f32 %v51_v5, %v52_v9  ;;  %v46_v14 = vmin.f32 %v44_v6, %v45_v10  ;;  %v60_v15 = vmax.f32 %v58_v7, %v59_v11  ;;  %p235_p11 = por %p234_p10, %p233_p9 }
  0x1c   :  { %v40_v16 = vrot.slane %v39_v12, 2  ;;  %v54_v17 = vrot.slane %v53_v13, 2  ;;  %v47_v18 = vrot.slane %v46_v14, 2  ;;  %v61_v22 = vrot.slane %v60_v15, 2  ;;  %p236_p12 = pnand %p235_p11, %p229_p8 }
  0x1e   :  { %v41_v23 = vmin.f32 %v39_v12, %v40_v16  ;;  %v55_v24 = vmax.f32 %v53_v13, %v54_v17  ;;  %v48_v25 = vmin.f32 %v46_v14, %v47_v18  ;;  %v62_v26 = vmax.f32 %v60_v15, %v61_v22 }
  0x20   :  { %v42_v27 = vrot.slane %v41_v23, 1  ;;  %v56_v28 = vrot.slane %v55_v24, 1  ;;  %v49_v29 = vrot.slane %v48_v25, 1  ;;  %v63_v32 = vrot.slane %v62_v26, 1 }
  0x22   :  { %v43_v33 = vmin.f32 %v41_v23, %v42_v27  ;;  %v57_v34 = vmax.f32 %v55_v24, %v56_v28  ;;  %v50_v35 = vmin.f32 %v48_v25, %v49_v29  ;;  %v64_v36 = vmax.f32 %v62_v26, %v63_v32 }
  0x24   :  { %v68_v37 = vmul.f32 0.9, %v43_v33  ;;  %v90_v38 = vmul.f32 0.9, %v57_v34  ;;  %v69_v39 = vmul.f32 0.9, %v50_v35 }
  0x25   :  { %v91_v41 = vmul.f32 0.9, %v64_v36 }
  0x26   :  { %v72_v44 = vcombine.low %v68_v37, %v69_v39 }
  0x27   :  { %v94_v45 = vcombine.low %v90_v38, %v91_v41 }
  0x28   :  { %v79_v47 = vrot.slane %v72_v44, %v78_v40 }
  0x29   :  { %v101_v49 = vrot.slane %v94_v45, %v78_v40 }
  0x2a   :  { %v86_v50 = vrot.slane %v79_v47, %v78_v40 }
  0x2b   :  { %v108_v51 = vrot.slane %v101_v49, %v78_v40 }
  0x2c   :  { %v88_v52 = vadd.f32 %v86_v50, %v67_v46 }
  0x2d   :  { %v110_v53 = vadd.f32 %v108_v51, %v89_v48 }
  0x2e   :  { %115 = vst.msk [vmem:[#allocation6] sm:$0x3] %vm113_vm0, %v88_v52 }
  0x2f   :  { %116 = vst.msk [vmem:[#allocation8] sm:$0x3] %vm113_vm0, %v110_v53  ;;  %v117_v54 = vsub.f32 %v110_v53, %v88_v52 }
  0x30   :  { %239 = shalt.err (!%p236_p12)
}
  0x31   :  { %s240_s15 = scalar_lea.hbm %s433_s4, 32 }
  0x32   :  { %p241_p13 = scmp.ne.s32.totalorder %s433_s4, %s240_s15  ;;  %p244_p0 = scmp.lt.u32.totalorder %s240_s15, %s433_s4 }
  0x34   :  { %p246_p1 = pnand %p244_p0, %p241_p13 }
  0x36   :  { %249 = shalt.err (!%p246_p1)
}
  0x37   :  { %174 = dma.vmem_to_hbm [thread:$0]  %s172_s11, 32, %s433_s4, [#allocation7]   ;;  %204 = vrcp.f32 %v117_v54 }
  0x38   :  { %s250_s22 = scalar_lea.vmem %s377_s13, 32  ;;  %p255_p3 = scmp.lt.s32.totalorder %s377_s13, %s377_s13 }
  0x39   :  { %p251_p2 = scmp.ne.s32.totalorder %s377_s13, %s250_s22  ;;  %p256_p4 = scmp.lt.s32.totalorder %s250_s22, %s250_s22 }
  0x3b   :  { %p257_p5 = por %p256_p4, %p255_p3 }
  0x3d   :  { %p258_p6 = pnand %p257_p5, %p251_p2 }
  0x3f   :  { %261 = shalt.err (!%p258_p6)
}
  0x40   :  { %s262_s25 = scalar_lea.hbm %s434_s5, 32 }
  0x41   :  { %p263_p7 = scmp.ne.s32.totalorder %s434_s5, %s262_s25  ;;  %p266_p8 = scmp.lt.u32.totalorder %s262_s25, %s434_s5 }
  0x43   :  { %p268_p9 = pnand %p266_p8, %p263_p7 }
  0x45   :  { %271 = shalt.err (!%p268_p9)
}
  0x46   :  { %184 = dma.vmem_to_hbm [thread:$0]  %s377_s13, 32, %s434_s5, [#allocation7]   ;;  %v122_v55 = vsub.s32 0, %v368_v31  ;;  %v126_v56 = vsub.s32 1, %v368_v31  ;;  %v205_v63 = vpop.eup %204 }
  0x47   :  { %s306_s7 = smov [#allocation5]  }
  0x48   :  { %v123_v57 = vrot.slane %v88_v52, %v122_v55  ;;  %v127_v58 = vrot.slane %v88_v52, %v126_v56  ;;  %s158_s8 = sshll.u32 %s306_s7, 4  ;;  %v138_v4 = vrot.slane %v205_v63, %v122_v55  ;;  %v142_v5 = vrot.slane %v205_v63, %v126_v56  ;;  %s159_s8 = int_to_ptr.vmem [resolvable:$true] %s158_s8 }
  0x49   :  { %s272_s5 = scalar_lea.vmem %s159_s8, 512  ;;  %p277_p11 = scmp.lt.s32.totalorder %s159_s8, %s159_s8 }
  0x4a   :  { %v130_v59 = vsub.f32 %v352_v0, %v123_v57  ;;  %v131_v60 = vsub.f32 %v354_v1, %v127_v58  ;;  %v132_v61 = vsub.f32 %v356_v2, %v123_v57  ;;  %v133_v62 = vsub.f32 %v358_v3, %v127_v58  ;;  %p273_p10 = scmp.ne.s32.totalorder %s159_s8, %s272_s5  ;;  %p278_p12 = scmp.lt.s32.totalorder %s272_s5, %s272_s5 }
  0x4c   :  { %v145_v6 = vmul.f32 %v138_v4, %v130_v59  ;;  %v146_v7 = vmul.f32 %v142_v5, %v131_v60  ;;  %v147_v8 = vmul.f32 %v138_v4, %v132_v61  ;;  %v148_v9 = vmul.f32 %v142_v5, %v133_v62  ;;  %p279_p13 = por %p278_p12, %p277_p11 }
  0x4e   :  { %149 = vst [vmem:[#allocation5] sm:$0xff] %v145_v6  ;;  %150 = vst [vmem:[#allocation5 + $0x8] sm:$0xff] %v146_v7  ;;  %p280_p0 = pnand %p279_p13, %p273_p10 }
  0x4f   :  { %151 = vst [vmem:[#allocation5 + $0x10] sm:$0xff] %v147_v8  ;;  %152 = vst [vmem:[#allocation5 + $0x18] sm:$0xff] %v148_v9 }
  0x50   :  { %283 = shalt.err (!%p280_p0)
}
  0x51   :  { %s284_s11 = scalar_lea.hbm %s432_s3, 512 }
  0x52   :  { %p285_p1 = scmp.ne.s32.totalorder %s432_s3, %s284_s11  ;;  %p288_p2 = scmp.lt.u32.totalorder %s284_s11, %s432_s3 }
  0x54   :  { %p290_p3 = pnand %p288_p2, %p285_p1 }
  0x56   :  { %293 = shalt.err (!%p290_p3)
}
  0x57   :  { %164 = dma.vmem_to_hbm [thread:$0]  %s159_s8, 512, %s432_s3, [#allocation4], %s301_s28, %s301_s28, %s302_s29  }
  0x58   :  { %296 = dma.done.wait [#allocation4], 512  }
  0x59   :  { %297 = vsyncadd [#allocation4], 4294966784 }
  0x5a   :  { %298 = dma.done.wait [#allocation7], 64  }
  0x5b   :  { %299 = vsyncadd [#allocation7], 4294967232 }
  0x5c   :  { %194 = vsyncpa [#allocation3], 1 }
  0x5d   :  { %195 = vsyncpa [#allocation4], 1 }
  0x5e   :  { %196 = vsyncpa [#allocation7], 1 }

</bundles_post_ra>
